<compile_context>
chip_gen: v7x
topology: tpu7x:2x2x1
jax: 0.10.0
libtpu: 0.0.40
codegen_flags: <defaults>
</compile_context>

<pallas_src>
import jax
import jax.numpy as jnp
from jax.experimental import pallas as pl
from jax.experimental.pallas import tpu as pltpu


def _round_up(n, m):
    return ((n + m - 1) // m) * m


def _num_tensorcores():
    """Best-effort TensorCore count (2 on v7x-style parts, else 1)."""
    try:
        info = pltpu.get_tpu_info()
        for attr in ("num_cores", "core_count", "num_tensorcores",
                     "tensorcore_count"):
            v = getattr(info, attr, None)
            if isinstance(v, int) and v > 0:
                return v
    except Exception:
        pass
    try:
        dev = jax.devices()[0]
        for attr in ("num_cores", "core_count"):
            v = getattr(dev, attr, None)
            if isinstance(v, int) and v > 0:
                return v
    except Exception:
        pass
    return 1


def _mlp_kernel(x_ref, w1_ref, b1_ref, w2_ref, b2_ref, w3_ref, b3_ref,
                w4_ref, b4_ref, o_ref):
    # bf16 MXU operands, f32 accumulation; biases added in f32.
    x = x_ref[...].astype(jnp.bfloat16)

    # Layer 1: Linear(input_size, 64) + ReLU
    h = jnp.dot(x, w1_ref[...], preferred_element_type=jnp.float32)
    h = jnp.maximum(h + b1_ref[...], 0.0)

    # Layer 2: Linear(64, 64) + ReLU
    h = jnp.dot(h.astype(jnp.bfloat16), w2_ref[...],
                preferred_element_type=jnp.float32)
    h = jnp.maximum(h + b2_ref[...], 0.0)

    # Layer 3: Linear(64, 64) + ReLU
    h = jnp.dot(h.astype(jnp.bfloat16), w3_ref[...],
                preferred_element_type=jnp.float32)
    h = jnp.maximum(h + b3_ref[...], 0.0)

    # Output layer: Linear(64, output_size), no activation
    out = jnp.dot(h.astype(jnp.bfloat16), w4_ref[...],
                  preferred_element_type=jnp.float32)
    o_ref[...] = (out + b4_ref[...]).astype(o_ref.dtype)


def behavior_cloning_forward(x, params, *, block_b=4096):
    """Fused MLP forward.

    x:      (..., input_size), f32 or bf16 (output dtype follows x).
    params: dict with w1..w4 of shape (in_features, out_features) and
            b1..b4 of shape (1, out_features), float32.
    """
    orig_shape = x.shape
    if x.ndim != 2:
        x = x.reshape(-1, orig_shape[-1])
    B, in_size = x.shape
    hidden = params["w1"].shape[1]
    out_size = params["w4"].shape[1]
    out_dtype = x.dtype

    # --- tile / grid selection (no input pad, no output slice) ---------------
    n_cores = _num_tensorcores()
    n_tiles = pl.cdiv(B, block_b)
    if n_cores > 1 and B >= 16:
        # Only on multi-TensorCore chips (v7x): keep >=2 tiles and a grid that
        # is a multiple of the core count so the tail step doesn't idle a core.
        n_tiles = n_cores * pl.cdiv(n_tiles, n_cores)
    tile = _round_up(pl.cdiv(B, n_tiles), 8)
    if tile >= B:
        # Single full-extent block: legal for any B (block dims == array dims),
        # zero padding, one grid step.
        tile = B
    grid = (pl.cdiv(B, tile),)
    # else: tile is a multiple of 8 (< B); the last block may be partial and
    # Pallas masks the out-of-range output rows.

    # --- param dtypes ---------------------------------------------------------
    # Weights as bf16 MXU operands; biases stay f32 (added to f32 accumulator).
    bf = jnp.bfloat16
    w1, w2, w3, w4 = (params[k].astype(bf) for k in ("w1", "w2", "w3", "w4"))
    b1, b2, b3, b4 = (params[k].astype(jnp.float32)
                      for k in ("b1", "b2", "b3", "b4"))

    # Weights/biases are tiny: full blocks, constant index_map -> VMEM-resident
    # across all grid steps.
    full = lambda shape: pl.BlockSpec(shape, lambda i: (0, 0))

    flops = 2 * B * (in_size * hidden + 2 * hidden * hidden + hidden * out_size)
    itm = jnp.dtype(out_dtype).itemsize
    bytes_accessed = (
        B * in_size * x.dtype.itemsize + B * out_size * itm        # x + out
        + 2 * (in_size * hidden + 2 * hidden * hidden + hidden * out_size)  # bf16 W
        + 4 * (3 * hidden + out_size))                             # f32 biases

    out = pl.pallas_call(
        _mlp_kernel,
        out_shape=jax.ShapeDtypeStruct((B, out_size), out_dtype),
        grid=grid,
        in_specs=[
            pl.BlockSpec((tile, in_size), lambda i: (i, 0)),   # x (batch-tiled)
            full((in_size, hidden)),   # w1
            full((1, hidden)),         # b1
            full((hidden, hidden)),    # w2
            full((1, hidden)),         # b2
            full((hidden, hidden)),    # w3
            full((1, hidden)),         # b3
            full((hidden, out_size)),  # w4
            full((1, out_size)),       # b4
        ],
        out_specs=pl.BlockSpec((tile, out_size), lambda i: (i, 0)),
        compiler_params=pltpu.CompilerParams(
            dimension_semantics=("parallel",),
            vmem_limit_bytes=32 * 1024 * 1024,
        ),
        cost_estimate=pl.CostEstimate(
            flops=flops, transcendentals=0, bytes_accessed=bytes_accessed),
    )(x, w1, b1, w2, b2, w3, b3, w4, b4)

    if len(orig_shape) != 2:
        out = out.reshape(*orig_shape[:-1], out_size)
    return out


def init_params(key, input_size, output_size, hidden=64):
    """PyTorch-style uniform(-1/sqrt(fan_in), 1/sqrt(fan_in)) init, f32."""
    dims = [(input_size, hidden), (hidden, hidden), (hidden, hidden),
            (hidden, output_size)]
    params = {}
    for idx, (fan_in, fan_out) in enumerate(dims, start=1):
        key, kw, kb = jax.random.split(key, 3)
        bound = 1.0 / jnp.sqrt(float(fan_in))
        params[f"w{idx}"] = jax.random.uniform(
            kw, (fan_in, fan_out), jnp.float32, -bound, bound)
        params[f"b{idx}"] = jax.random.uniform(
            kb, (1, fan_out), jnp.float32, -bound, bound)
    return params


def reference_forward_f32(x, params):
    h = jnp.maximum(x @ params["w1"] + params["b1"], 0.0)
    h = jnp.maximum(h @ params["w2"] + params["b2"], 0.0)
    h = jnp.maximum(h @ params["w3"] + params["b3"], 0.0)
    return h @ params["w4"] + params["b4"]


def reference_forward_bf16(x, params):
    """Same bf16-operand / f32-accumulate recipe as the kernel."""
    bf = jnp.bfloat16
    h = x
    for i in (1, 2, 3):
        h = jnp.dot(h.astype(bf), params[f"w{i}"].astype(bf),
                    preferred_element_type=jnp.float32) + params[f"b{i}"]
        h = jnp.maximum(h, 0.0)
    return jnp.dot(h.astype(bf), params["w4"].astype(bf),
                   preferred_element_type=jnp.float32) + params["b4"]


if __name__ == "__main__":
    key = jax.random.PRNGKey(0)
    key, kx, kp = jax.random.split(key, 3)

    input_size, output_size = 32, 16
    params = init_params(kp, input_size, output_size)

    # Case 1: small batch -> single full-extent block, grid=(1,), no padding.
    x_small = jax.random.normal(kx, (4, input_size), jnp.float32)
    out_small = jax.block_until_ready(behavior_cloning_forward(x_small, params))
    assert out_small.shape == (4, output_size)
    assert jnp.allclose(out_small, reference_forward_bf16(x_small, params),
                        atol=1e-3, rtol=1e-3), "small: mismatch vs bf16 ref"
    assert jnp.allclose(out_small, reference_forward_f32(x_small, params),
                        atol=5e-2, rtol=5e-2), "small: mismatch vs f32 ref"

    # Case 2: non-dividing batch with a tiny block_b to exercise the masked
    # partial-last-block path that replaced the old pad/slice round trip.
    key, kx2 = jax.random.split(key)
    x_edge = jax.random.normal(kx2, (20, input_size), jnp.float32)
    out_edge = jax.block_until_ready(
        behavior_cloning_forward(x_edge, params, block_b=8))
    assert out_edge.shape == (20, output_size)
    assert jnp.allclose(out_edge, reference_forward_bf16(x_edge, params),
                        atol=1e-3, rtol=1e-3), "edge: mismatch vs bf16 ref"
    assert jnp.allclose(out_edge, reference_forward_f32(x_edge, params),
                        atol=5e-2, rtol=5e-2), "edge: mismatch vs f32 ref"

    print("KERNEL_OK")
</pallas_src>

<mosaic_0001>
module attributes {stable_mosaic.version = 11 : i64} {
  func.func @_mlp_kernel(%arg0: i32, %arg1: memref<4x32xf32, #tpu.memory_space<vmem>>, %arg2: memref<32x64xbf16, #tpu.memory_space<vmem>>, %arg3: memref<1x64xf32, #tpu.memory_space<vmem>>, %arg4: memref<64x64xbf16, #tpu.memory_space<vmem>>, %arg5: memref<1x64xf32, #tpu.memory_space<vmem>>, %arg6: memref<64x64xbf16, #tpu.memory_space<vmem>>, %arg7: memref<1x64xf32, #tpu.memory_space<vmem>>, %arg8: memref<64x16xbf16, #tpu.memory_space<vmem>>, %arg9: memref<1x16xf32, #tpu.memory_space<vmem>>, %arg10: memref<4x16xf32, #tpu.memory_space<vmem>>) attributes {dimension_semantics = [#tpu.dimension_semantics<parallel>], iteration_bounds = array<i64: 1>, scalar_prefetch = 0 : i64, scratch_operands = 0 : i64, tpu.core_type = #tpu.core_type<tc>, window_params = [{transform_indices = @transform_0, window_bounds = array<i64: 4, 32>}, {pipeline_mode = #tpu.pipeline_mode<synchronous>, transform_indices = @transform_1, window_bounds = array<i64: 32, 64>}, {pipeline_mode = #tpu.pipeline_mode<synchronous>, transform_indices = @transform_2, window_bounds = array<i64: 1, 64>}, {pipeline_mode = #tpu.pipeline_mode<synchronous>, transform_indices = @transform_3, window_bounds = array<i64: 64, 64>}, {pipeline_mode = #tpu.pipeline_mode<synchronous>, transform_indices = @transform_4, window_bounds = array<i64: 1, 64>}, {pipeline_mode = #tpu.pipeline_mode<synchronous>, transform_indices = @transform_5, window_bounds = array<i64: 64, 64>}, {pipeline_mode = #tpu.pipeline_mode<synchronous>, transform_indices = @transform_6, window_bounds = array<i64: 1, 64>}, {pipeline_mode = #tpu.pipeline_mode<synchronous>, transform_indices = @transform_7, window_bounds = array<i64: 64, 16>}, {pipeline_mode = #tpu.pipeline_mode<synchronous>, transform_indices = @transform_8, window_bounds = array<i64: 1, 16>}, {transform_indices = @transform_9, window_bounds = array<i64: 4, 16>}]} {
    %c0 = arith.constant 0 : index
    %c0_0 = arith.constant 0 : index
    %0 = vector.load %arg1[%c0, %c0_0] : memref<4x32xf32, #tpu.memory_space<vmem>>, vector<4x32xf32>
    %1 = arith.truncf %0 : vector<4x32xf32> to vector<4x32xbf16>
    %c0_1 = arith.constant 0 : index
    %c0_2 = arith.constant 0 : index
    %2 = vector.load %arg2[%c0_1, %c0_2] : memref<32x64xbf16, #tpu.memory_space<vmem>>, vector<32x64xbf16>
    %cst = arith.constant dense<0.000000e+00> : vector<4x64xf32>
    %3 = tpu.matmul %1, %2, %cst {dimension_numbers = #tpu.dot_dimension_numbers<[1], [0], [0], [1], [0, 0, 1, 1], [], []>} : vector<4x32xbf16>, vector<32x64xbf16>, vector<4x64xf32> -> vector<4x64xf32>
    %c0_3 = arith.constant 0 : index
    %c0_4 = arith.constant 0 : index
    %4 = vector.load %arg3[%c0_3, %c0_4] : memref<1x64xf32, #tpu.memory_space<vmem>>, vector<1x64xf32>
    %5 = vector.broadcast %4 : vector<1x64xf32> to vector<4x64xf32>
    %6 = arith.addf %3, %5 : vector<4x64xf32>
    %cst_5 = arith.constant 0.000000e+00 : f32
    %7 = vector.broadcast %cst_5 : f32 to vector<4x64xf32>
    %8 = arith.maximumf %6, %7 : vector<4x64xf32>
    %9 = arith.truncf %8 : vector<4x64xf32> to vector<4x64xbf16>
    %c0_6 = arith.constant 0 : index
    %c0_7 = arith.constant 0 : index
    %10 = vector.load %arg4[%c0_6, %c0_7] : memref<64x64xbf16, #tpu.memory_space<vmem>>, vector<64x64xbf16>
    %cst_8 = arith.constant dense<0.000000e+00> : vector<4x64xf32>
    %11 = tpu.matmul %9, %10, %cst_8 {dimension_numbers = #tpu.dot_dimension_numbers<[1], [0], [0], [1], [0, 0, 1, 1], [], []>} : vector<4x64xbf16>, vector<64x64xbf16>, vector<4x64xf32> -> vector<4x64xf32>
    %c0_9 = arith.constant 0 : index
    %c0_10 = arith.constant 0 : index
    %12 = vector.load %arg5[%c0_9, %c0_10] : memref<1x64xf32, #tpu.memory_space<vmem>>, vector<1x64xf32>
    %13 = vector.broadcast %12 : vector<1x64xf32> to vector<4x64xf32>
    %14 = arith.addf %11, %13 : vector<4x64xf32>
    %cst_11 = arith.constant 0.000000e+00 : f32
    %15 = vector.broadcast %cst_11 : f32 to vector<4x64xf32>
    %16 = arith.maximumf %14, %15 : vector<4x64xf32>
    %17 = arith.truncf %16 : vector<4x64xf32> to vector<4x64xbf16>
    %c0_12 = arith.constant 0 : index
    %c0_13 = arith.constant 0 : index
    %18 = vector.load %arg6[%c0_12, %c0_13] : memref<64x64xbf16, #tpu.memory_space<vmem>>, vector<64x64xbf16>
    %cst_14 = arith.constant dense<0.000000e+00> : vector<4x64xf32>
    %19 = tpu.matmul %17, %18, %cst_14 {dimension_numbers = #tpu.dot_dimension_numbers<[1], [0], [0], [1], [0, 0, 1, 1], [], []>} : vector<4x64xbf16>, vector<64x64xbf16>, vector<4x64xf32> -> vector<4x64xf32>
    %c0_15 = arith.constant 0 : index
    %c0_16 = arith.constant 0 : index
    %20 = vector.load %arg7[%c0_15, %c0_16] : memref<1x64xf32, #tpu.memory_space<vmem>>, vector<1x64xf32>
    %21 = vector.broadcast %20 : vector<1x64xf32> to vector<4x64xf32>
    %22 = arith.addf %19, %21 : vector<4x64xf32>
    %cst_17 = arith.constant 0.000000e+00 : f32
    %23 = vector.broadcast %cst_17 : f32 to vector<4x64xf32>
    %24 = arith.maximumf %22, %23 : vector<4x64xf32>
    %25 = arith.truncf %24 : vector<4x64xf32> to vector<4x64xbf16>
    %c0_18 = arith.constant 0 : index
    %c0_19 = arith.constant 0 : index
    %26 = vector.load %arg8[%c0_18, %c0_19] : memref<64x16xbf16, #tpu.memory_space<vmem>>, vector<64x16xbf16>
    %cst_20 = arith.constant dense<0.000000e+00> : vector<4x16xf32>
    %27 = tpu.matmul %25, %26, %cst_20 {dimension_numbers = #tpu.dot_dimension_numbers<[1], [0], [0], [1], [0, 0, 1, 1], [], []>} : vector<4x64xbf16>, vector<64x16xbf16>, vector<4x16xf32> -> vector<4x16xf32>
    %c0_21 = arith.constant 0 : index
    %c0_22 = arith.constant 0 : index
    %28 = vector.load %arg9[%c0_21, %c0_22] : memref<1x16xf32, #tpu.memory_space<vmem>>, vector<1x16xf32>
    %29 = vector.broadcast %28 : vector<1x16xf32> to vector<4x16xf32>
    %30 = arith.addf %27, %29 : vector<4x16xf32>
    %c0_23 = arith.constant 0 : index
    %c0_24 = arith.constant 0 : index
    %31 = vector.load %arg10[%c0_23, %c0_24] : memref<4x16xf32, #tpu.memory_space<vmem>>, vector<4x16xf32>
    tpu.vector_store %arg10[%c0_23, %c0_24], %30 {strides = array<i32>} : memref<4x16xf32, #tpu.memory_space<vmem>>, vector<4x16xf32>,
    return
  }
  func.func @transform_0(%arg0: i32) -> (i32, i32) {
    %c0_i32 = arith.constant 0 : i32
    %c0_i32_0 = arith.constant 0 : i32
    return %arg0, %c0_i32 : i32, i32
  }
  func.func @transform_1(%arg0: i32) -> (i32, i32) {
    %c0_i32 = arith.constant 0 : i32
    %c0_i32_0 = arith.constant 0 : i32
    %c0_i32_1 = arith.constant 0 : i32
    return %c0_i32, %c0_i32_0 : i32, i32
  }
  func.func @transform_2(%arg0: i32) -> (i32, i32) {
    %c0_i32 = arith.constant 0 : i32
    %c0_i32_0 = arith.constant 0 : i32
    %c0_i32_1 = arith.constant 0 : i32
    return %c0_i32, %c0_i32_0 : i32, i32
  }
  func.func @transform_3(%arg0: i32) -> (i32, i32) {
    %c0_i32 = arith.constant 0 : i32
    %c0_i32_0 = arith.constant 0 : i32
    %c0_i32_1 = arith.constant 0 : i32
    return %c0_i32, %c0_i32_0 : i32, i32
  }
  func.func @transform_4(%arg0: i32) -> (i32, i32) {
    %c0_i32 = arith.constant 0 : i32
    %c0_i32_0 = arith.constant 0 : i32
    %c0_i32_1 = arith.constant 0 : i32
    return %c0_i32, %c0_i32_0 : i32, i32
  }
  func.func @transform_5(%arg0: i32) -> (i32, i32) {
    %c0_i32 = arith.constant 0 : i32
    %c0_i32_0 = arith.constant 0 : i32
    %c0_i32_1 = arith.constant 0 : i32
    return %c0_i32, %c0_i32_0 : i32, i32
  }
  func.func @transform_6(%arg0: i32) -> (i32, i32) {
    %c0_i32 = arith.constant 0 : i32
    %c0_i32_0 = arith.constant 0 : i32
    %c0_i32_1 = arith.constant 0 : i32
    return %c0_i32, %c0_i32_0 : i32, i32
  }
  func.func @transform_7(%arg0: i32) -> (i32, i32) {
    %c0_i32 = arith.constant 0 : i32
    %c0_i32_0 = arith.constant 0 : i32
    %c0_i32_1 = arith.constant 0 : i32
    return %c0_i32, %c0_i32_0 : i32, i32
  }
  func.func @transform_8(%arg0: i32) -> (i32, i32) {
    %c0_i32 = arith.constant 0 : i32
    %c0_i32_0 = arith.constant 0 : i32
    %c0_i32_1 = arith.constant 0 : i32
    return %c0_i32, %c0_i32_0 : i32, i32
  }
  func.func @transform_9(%arg0: i32) -> (i32, i32) {
    %c0_i32 = arith.constant 0 : i32
    %c0_i32_0 = arith.constant 0 : i32
    return %arg0, %c0_i32 : i32, i32
  }
}

</mosaic_0001>

<bundles_post_ra>
// kernel: tpu_custom_call.1
= control target key start
LH: loop header
LB: loop body
LE: loop exit
PB: predicated region body
PF: predicated region fallthrough
CT: control target
= control target key end

     0   :  { %14 = vsyncpa [#allocation3], 0  ;;  %s744_s0 = inlined_call_operand.hbm [shape: f32[4,32], index: 0, kind: input, shape index: {}]   ;;  %s745_s1 = inlined_call_operand.vmem [shape: bf16[32,64], index: 1, kind: input, shape index: {}]   ;;  %s746_s2 = inlined_call_operand.vmem [shape: f32[1,64], index: 2, kind: input, shape index: {}]   ;;  %s747_s3 = inlined_call_operand.vmem [shape: bf16[64,64], index: 3, kind: input, shape index: {}]   ;;  %s748_s4 = inlined_call_operand.vmem [shape: f32[1,64], index: 4, kind: input, shape index: {}]   ;;  %s749_s5 = inlined_call_operand.hbm [shape: bf16[64,64], index: 5, kind: input, shape index: {}]   ;;  %s750_s6 = inlined_call_operand.vmem [shape: f32[1,64], index: 6, kind: input, shape index: {}]   ;;  %s751_s7 = inlined_call_operand.vmem [shape: bf16[64,16], index: 7, kind: input, shape index: {}]   ;;  %s752_s8 = inlined_call_operand.vmem [shape: f32[1,16], index: 8, kind: input, shape index: {}]   ;;  %s753_s9 = inlined_call_operand.hbm [shape: f32[4,16], index: 9, kind: output, shape index: {}]  }
   0x1   :  { %15 = vsyncpa [#allocation6], 0 }
   0x2   :  { %16 = vsyncpa [#allocation4], 0  ;;  %s577_s30 = smov [#allocation2]   ;;  %s578_s11 = smov [#allocation5]  }
   0x3   :  { %s23_s10 = sshll.u32 %s577_s30, 4  ;;  %s40_s12 = sshll.u32 %s578_s11, 4  ;;  %s24_s10 = int_to_ptr.vmem [resolvable:$true] %s23_s10  ;;  %s634_s12 = int_to_ptr.vmem [resolvable:$true] %s40_s12 }
   0x4   :  { %s505_s15 = scalar_lea.hbm %s744_s0, 64 }
   0x5   :  { %p506_p0 = scmp.ne.s32.totalorder %s744_s0, %s505_s15  ;;  %p509_p1 = scmp.lt.u32.totalorder %s505_s15, %s744_s0 }
   0x7   :  { %p511_p2 = pnand %p509_p1, %p506_p0 }
   0x9   :  { %514 = shalt.err (!%p511_p2)
}
   0xa   :  { %s515_s20 = scalar_lea.vmem %s24_s10, 64  ;;  %p520_p4 = scmp.lt.s32.totalorder %s24_s10, %s24_s10 }
   0xb   :  { %p516_p3 = scmp.ne.s32.totalorder %s24_s10, %s515_s20  ;;  %p521_p5 = scmp.lt.s32.totalorder %s515_s20, %s515_s20 }
   0xd   :  { %p522_p6 = por %p521_p5, %p520_p4 }
   0xf   :  { %p523_p7 = pnand %p522_p6, %p516_p3 }
  0x11   :  { %526 = shalt.err (!%p523_p7)
}
  0x12   :  { %26 = dma.hbm_to_vmem [thread:$0]  %s744_s0, 64, %s24_s10, [#allocation3]  }
  0x13   :  { %s527_s25 = scalar_lea.hbm %s749_s5, 512 }
  0x14   :  { %p528_p8 = scmp.ne.s32.totalorder %s749_s5, %s527_s25  ;;  %p531_p9 = scmp.lt.u32.totalorder %s527_s25, %s749_s5 }
  0x16   :  { %p533_p10 = pnand %p531_p9, %p528_p8 }
  0x18   :  { %536 = shalt.err (!%p533_p10)
}
  0x19   :  { %s537_s30 = scalar_lea.vmem %s634_s12, 512  ;;  %p542_p12 = scmp.lt.s32.totalorder %s634_s12, %s634_s12 }
  0x1a   :  { %p538_p11 = scmp.ne.s32.totalorder %s634_s12, %s537_s30  ;;  %p543_p13 = scmp.lt.s32.totalorder %s537_s30, %s537_s30 }
  0x1c   :  { %p544_p0 = por %p543_p13, %p542_p12 }
  0x1e   :  { %p545_p1 = pnand %p544_p0, %p538_p11 }
  0x20   :  { %548 = shalt.err (!%p545_p1)
}
  0x21   :  { %s579_s0 = smov 64   ;;  %s580_s10 = smov 4  }
  0x22   :  { %46 = dma.hbm_to_vmem [thread:$0]  %s749_s5, 512, %s634_s12, [#allocation6], %s579_s0, %s579_s0, %s580_s10  }
  0x23   :  { %571 = dma.done.wait [#allocation3], 64  }
  0x24   :  { %572 = vsyncadd [#allocation3], 4294967232 }
  0x25   :  { %573 = dma.done.wait [#allocation6], 512  }
  0x26   :  { %574 = vsyncadd [#allocation6], 4294966784  ;;  %v581_v0 = vmov 0.0   ;;  %vm582_vm0 = vmmov 0   ;;  %v491_v1 = vld [vmem:[%s745_s1] sm:$0xff]   ;;  %v492_v2 = vld [vmem:[%s745_s1 + $0x8] sm:$0xff]  }
  0x27   :  { %440 = vmatprep.subr.bf16.mxu0 %v581_v0  ;;  %444 = vmatprep.mubr.msk.bf16.mxu0 %vm582_vm0, %v581_v0  ;;  %v60_v3 = vld [vmem:[#allocation2] sm:$0xf]  ;;  %vm85_vm1 = vcmask 261120   ;;  %v494_v5 = vld [vmem:[%s747_s3 + $0x8] sm:$0xff]   ;;  %v495_v7 = vld [vmem:[%s747_s3 + $0x10] sm:$0xff]   ;;  %vm170_vm2 = vcmask 523264  }
  0x28   :  { %448 = vmatprep.subr.bf16.mxu1 %v581_v0  ;;  %456 = vmatprep.mubr.msk.bf16.mxu1 %vm582_vm0, %v581_v0  ;;  %v493_v4 = vld [vmem:[%s747_s3] sm:$0xff]   ;;  %v61_v6 = vpack.c.bf16 %v60_v3, %v60_v3  ;;  %v496_v8 = vld [vmem:[%s747_s3 + $0x18] sm:$0xff]   ;;  %v498_v10 = vld [vmem:[#allocation5 + $0x8] sm:$0xff]   ;;  %s583_s15 = smov [#allocation7]   ;;  %vm382_vm3 = vcmask 125952  }
  0x29   :  { %441 = vmatpush3.bf16.msra.mxu0 %v491_v1  ;;  %449 = vmatpush3.bf16.msra.mxu1 %v493_v4  ;;  %v497_v9 = vld [vmem:[#allocation5] sm:$0xff]   ;;  %v400_v11 = vld [vmem:[%s746_s2] ss:$0 sm:$0xff]  ;;  %v499_v19 = vld [vmem:[#allocation5 + $0x10] sm:$0xff]  }
  0x2a   :  { %442 = vmatprep.subr.bf16.mxu0 %v581_v0  ;;  %450 = vmatprep.subr.bf16.mxu1 %v581_v0  ;;  %v500_v20 = vld [vmem:[#allocation5 + $0x18] sm:$0xff]   ;;  %v502_v22 = vld [vmem:[%s751_s7 + $0x8] sm:$0xff]   ;;  %v503_v31 = vld [vmem:[%s751_s7 + $0x10] sm:$0xff]  }
  0x2b   :  { %v501_v21 = vld [vmem:[%s751_s7] sm:$0xff]   ;;  %v504_v32 = vld [vmem:[%s751_s7 + $0x18] sm:$0xff]   ;;  %s390_s7 = sshll.u32 %s583_s15, 4  ;;  %s391_s7 = int_to_ptr.vmem [resolvable:$true] %s390_s7 }
  0x2c   :  { %v404_v23 = vld [vmem:[%s748_s4] ss:$0 sm:$0xff]  ;;  %p554_p3 = scmp.lt.s32.totalorder %s391_s7, %s391_s7 }
  0x2d   :  { %443 = vmatpush3.bf16.msra.mxu0 %v492_v2  ;;  %451 = vmatpush3.bf16.msra.mxu1 %v494_v5  ;;  %v410_v33 = vld [vmem:[%s750_s6] ss:$0 sm:$0xff]  ;;  %s549_s6 = scalar_lea.vmem %s391_s7, 64 }
  0x2e   :  { %460 = vmatprep.subr.bf16.mxu0 %v581_v0  ;;  %452 = vmatprep.subr.bf16.mxu1 %v581_v0  ;;  %v416_v41 = vld [vmem:[%s752_s8] ss:$0 sm:$0xff]  ;;  %p550_p2 = scmp.ne.s32.totalorder %s391_s7, %s549_s6  ;;  %p555_p4 = scmp.lt.s32.totalorder %s549_s6, %s549_s6 }
  0x30   :  { %445 = vmatmul.mubr.msk.bf16.vlgmr.msra.gmra.mrb[0].mxu0 %vm85_vm1, %v61_v6  ;;  %p556_p5 = por %p555_p4, %p554_p3 }
  0x31   :  { %468 = vmatprep.mubr.msk.bf16.mxu0 %vm582_vm0, %v581_v0  ;;  %453 = vmatpush3.bf16.msra.mxu1 %v495_v7 }
  0x32   :  { %454 = vmatprep.subr.bf16.mxu1 %v581_v0  ;;  %461 = vmatpush3.bf16.msra.mxu0 %v497_v9  ;;  %p557_p6 = pnand %p556_p5, %p550_p2 }
  0x33   :  { %462 = vmatprep.subr.bf16.mxu0 %v581_v0 }
  0x35   :  { %455 = vmatpush3.bf16.msra.mxu1 %v496_v8 }
  0x36   :  { %472 = vmatprep.subr.bf16.mxu1 %v581_v0  ;;  %463 = vmatpush3.bf16.msra.mxu0 %v498_v10 }
  0x37   :  { %464 = vmatprep.subr.bf16.mxu0 %v581_v0 }
  0x3a   :  { %465 = vmatpush3.bf16.msra.mxu0 %v499_v19 }
  0x3b   :  { %466 = vmatprep.subr.bf16.mxu0 %v581_v0 }
  0x3e   :  { %467 = vmatpush3.bf16.msra.mxu0 %v500_v20 }
 0x103   :  { %v123_v12 = vpop.f32.mrb[0].mxu0 }
 0x104   :  { %v124_v13 = vadd.f32 %v400_v11, %v123_v12  ;;  %v446_v14 = vpop.f32.mrb[1].mxu0 }
 0x105   :  { %v126_v15 = vpop.f32.mrb[2].mxu0 }
 0x106   :  { %v129_v16 = vmax.f32 %v124_v13, 0.0  ;;  %v447_v17 = vpop.f32.mrb[3].mxu0 }
 0x108   :  { %v130_v18 = vpack.c.bf16 %v129_v16, %v129_v16 }
 0x10a   :  { %457 = vmatmul.mubr.msk.bf16.vlgmr.msra.gmra.mrb[0].mxu1 %vm170_vm2, %v130_v18 }
 0x10b   :  { %480 = vmatprep.mubr.msk.bf16.mxu1 %vm582_vm0, %v581_v0  ;;  %473 = vmatpush3.bf16.msra.mxu1 %v501_v21 }
 0x10c   :  { %474 = vmatprep.subr.bf16.mxu1 %v581_v0 }
 0x10f   :  { %475 = vmatpush3.bf16.msra.mxu1 %v502_v22 }
 0x110   :  { %476 = vmatprep.subr.bf16.mxu1 %v581_v0 }
 0x113   :  { %477 = vmatpush3.bf16.msra.mxu1 %v503_v31 }
 0x114   :  { %478 = vmatprep.subr.bf16.mxu1 %v581_v0 }
 0x117   :  { %479 = vmatpush3.bf16.msra.mxu1 %v504_v32 }
 0x1dd   :  { %v208_v24 = vpop.f32.mrb[0].mxu1 }
 0x1de   :  { %v209_v25 = vadd.f32 %v404_v23, %v208_v24  ;;  %v458_v26 = vpop.f32.mrb[1].mxu1 }
 0x1df   :  { %v211_v27 = vpop.f32.mrb[2].mxu1 }
 0x1e0   :  { %v214_v28 = vmax.f32 %v209_v25, 0.0  ;;  %v459_v29 = vpop.f32.mrb[3].mxu1 }
 0x1e2   :  { %v215_v30 = vpack.c.bf16 %v214_v28, %v214_v28 }
 0x1e4   :  { %469 = vmatmul.mubr.msk.bf16.vlgmr.msra.gmra.mrb[4].mxu0 %vm170_vm2, %v215_v30 }
 0x2b7   :  { %v292_v34 = vpop.f32.mrb[4].mxu0 }
 0x2b8   :  { %v293_v35 = vadd.f32 %v410_v33, %v292_v34  ;;  %v470_v36 = vpop.f32.mrb[5].mxu0 }
 0x2b9   :  { %v295_v37 = vpop.f32.mrb[6].mxu0 }
 0x2ba   :  { %v298_v38 = vmax.f32 %v293_v35, 0.0  ;;  %v471_v39 = vpop.f32.mrb[7].mxu0 }
 0x2bc   :  { %v299_v40 = vpack.c.bf16 %v298_v38, %v298_v38 }
 0x2be   :  { %481 = vmatmul.mubr.msk.bf16.vlgmr.msra.gmra.mrb[4].mxu1 %vm170_vm2, %v299_v40 }
 0x391   :  { %v376_v42 = vpop.f32.mrb[4].mxu1 }
 0x392   :  { %v377_v43 = vadd.f32 %v416_v41, %v376_v42  ;;  %v482_v44 = vpop.f32.mrb[5].mxu1 }
 0x393   :  { %v379_v45 = vpop.f32.mrb[6].mxu1 }
 0x394   :  { %v483_v46 = vpop.f32.mrb[7].mxu1  ;;  %383 = vst.msk [vmem:[#allocation7] sm:$0xf] %vm382_vm3, %v377_v43 }
 0x395   :  { %560 = shalt.err (!%p557_p6)
}
 0x396   :  { %s561_s8 = scalar_lea.hbm %s753_s9, 64 }
 0x397   :  { %p562_p7 = scmp.ne.s32.totalorder %s753_s9, %s561_s8  ;;  %p565_p8 = scmp.lt.u32.totalorder %s561_s8, %s753_s9 }
 0x399   :  { %p567_p9 = pnand %p565_p8, %p562_p7 }
 0x39b   :  { %570 = shalt.err (!%p567_p9)
}
 0x39c   :  { %393 = dma.vmem_to_hbm [thread:$0]  %s391_s7, 64, %s753_s9, [#allocation4]  }
 0x39d   :  { %575 = dma.done.wait [#allocation4], 64  }
 0x39e   :  { %576 = vsyncadd [#allocation4], 4294967232 }
 0x39f   :  { %397 = vsyncpa [#allocation3], 1 }
 0x3a0   :  { %398 = vsyncpa [#allocation6], 1 }
 0x3a1   :  { %399 = vsyncpa [#allocation4], 1 }

</bundles_post_ra>
